<compile_context>
chip_gen: v6e
topology: v6e:2x2x1
jax: 0.10.0
libtpu: 0.0.40
codegen_flags: <defaults>
</compile_context>

<pallas_src>
import jax
import jax.numpy as jnp
from jax.experimental import pallas as pl
from jax.experimental.pallas import tpu as pltpu


def _round_up(x, m):
    return ((x + m - 1) // m) * m


def mlp4_kernel(x_ref, w1_ref, b1_ref, w2_ref, b2_ref, w3_ref, b3_ref, o_ref):
    # fc1: Linear(D, H1) + Sigmoid — bf16 operands on the MXU, f32 accumulate,
    # bias-add + sigmoid in f32 (EUP/VPU), downcast only at the next dot input.
    h1 = jnp.dot(x_ref[...], w1_ref[...], preferred_element_type=jnp.float32)
    h1 = jax.nn.sigmoid(h1 + b1_ref[...])
    # fc2: Linear(H1, H2) + Sigmoid
    h2 = jnp.dot(h1.astype(jnp.bfloat16), w2_ref[...],
                 preferred_element_type=jnp.float32)
    h2 = jax.nn.sigmoid(h2 + b2_ref[...])
    # fc3: Linear(H2, K)  (no activation)
    out = jnp.dot(h2.astype(jnp.bfloat16), w3_ref[...],
                  preferred_element_type=jnp.float32) + b3_ref[...]
    o_ref[...] = out.astype(o_ref.dtype)


def mlp4_forward(x_nchw, params, *, tile_b=256):
    """x_nchw: (B, C, H, W) float32. params: (in,out) f32 weights and (1,out) f32 biases."""
    B = x_nchw.shape[0]
    x = x_nchw.reshape(B, -1).astype(jnp.float32)  # nn.Flatten(): (B, D)
    D = x.shape[1]

    w1, b1 = params["w1"], params["b1"]
    w2, b2 = params["w2"], params["b2"]
    w3, b3 = params["w3"], params["b3"]
    H1, H2, K = w1.shape[1], w2.shape[1], w3.shape[1]

    # Lane-dense padding of all contraction/output dims (multiples of 128).
    Dp, H1p, H2p, Kp = (_round_up(d, 128) for d in (D, H1, H2, K))

    def pad2(a, rows, cols):
        return jnp.pad(a, ((0, rows - a.shape[0]), (0, cols - a.shape[1])))

    w1p = pad2(w1, Dp, H1p).astype(jnp.bfloat16)
    w2p = pad2(w2, H1p, H2p).astype(jnp.bfloat16)
    w3p = pad2(w3, H2p, Kp).astype(jnp.bfloat16)
    b1p = pad2(b1, 1, H1p).astype(jnp.float32)
    b2p = pad2(b2, 1, H2p).astype(jnp.float32)
    b3p = pad2(b3, 1, Kp).astype(jnp.float32)

    # Batch tiling: TILE_B is a multiple of 8, clamped so tiny batches stay a single step.
    tile_b = max(8, _round_up(min(tile_b, _round_up(B, 8)), 8))
    Bp = _round_up(B, tile_b)
    xp = jnp.pad(x, ((0, Bp - B), (0, Dp - D))).astype(jnp.bfloat16)

    grid = (Bp // tile_b,)

    # VMEM budget (double-buffered x/out tiles + resident weights + intermediates),
    # capped at v7x's 64 MiB physical VMEM.
    bytes_weights = (w1p.size + w2p.size + w3p.size) * 2            # bf16
    bytes_biases = (b1p.size + b2p.size + b3p.size) * 4             # f32
    bytes_tiles = 2 * (tile_b * Dp * 2 + tile_b * Kp * 4)           # 2x double-buffer
    bytes_interm = tile_b * (H1p + H2p) * (4 + 2)                   # f32 acts + bf16 copies
    vmem_limit = int(min(max(2 * (bytes_weights + bytes_biases + bytes_tiles
                                  + bytes_interm), 16 << 20), 64 << 20))

    cost = pl.CostEstimate(
        flops=2 * Bp * (Dp * H1p + H1p * H2p + H2p * Kp),
        transcendentals=Bp * (H1p + H2p),
        bytes_accessed=(xp.size * 2
                        + (w1p.size + w2p.size + w3p.size) * 2
                        + (b1p.size + b2p.size + b3p.size) * 4
                        + Bp * Kp * 4),
    )

    const = lambda a: pl.BlockSpec(a.shape, lambda i: (0, 0))  # weights/biases: resident

    out_padded = pl.pallas_call(
        mlp4_kernel,
        out_shape=jax.ShapeDtypeStruct((Bp, Kp), jnp.float32),
        grid=grid,
        in_specs=[
            pl.BlockSpec((tile_b, Dp), lambda i: (i, 0)),   # x: tiled over batch
            const(w1p), const(b1p),
            const(w2p), const(b2p),
            const(w3p), const(b3p),
        ],
        out_specs=pl.BlockSpec((tile_b, Kp), lambda i: (i, 0)),
        compiler_params=pltpu.CompilerParams(
            dimension_semantics=("parallel",),
            vmem_limit_bytes=vmem_limit,
        ),
        cost_estimate=cost,
    )(xp, w1p, b1p, w2p, b2p, w3p, b3p)

    return out_padded[:B, :K]


def init_params(key, D, H1, H2, K):
    """Deterministic init (PyTorch-Linear-style uniform bounds), weights stored as (in, out)."""
    ks = jax.random.split(key, 6)

    def lin(kw, kb, fan_in, fan_out):
        bound = 1.0 / jnp.sqrt(fan_in)
        w = jax.random.uniform(kw, (fan_in, fan_out), jnp.float32, -bound, bound)
        b = jax.random.uniform(kb, (1, fan_out), jnp.float32, -bound, bound)
        return w, b

    w1, b1 = lin(ks[0], ks[1], D, H1)
    w2, b2 = lin(ks[2], ks[3], H1, H2)
    w3, b3 = lin(ks[4], ks[5], H2, K)
    return {"w1": w1, "b1": b1, "w2": w2, "b2": b2, "w3": w3, "b3": b3}


def mlp4_reference(x_nchw, params):
    x = x_nchw.reshape(x_nchw.shape[0], -1)
    h1 = jax.nn.sigmoid(x @ params["w1"] + params["b1"])
    h2 = jax.nn.sigmoid(h1 @ params["w2"] + params["b2"])
    return h2 @ params["w3"] + params["b3"]


if __name__ == "__main__":
    # Small shapes: batch=8, input (8, 4, 4, 4) -> D=64, H1=32, H2=32, K=16
    B, C, H, W = 8, 4, 4, 4
    D, H1, H2, K = C * H * W, 32, 32, 16

    key = jax.random.PRNGKey(0)
    kx, kp = jax.random.split(key)
    x = jax.random.normal(kx, (B, C, H, W), jnp.float32)
    params = init_params(kp, D, H1, H2, K)

    out = mlp4_forward(x, params)
    jax.block_until_ready(out)

    ref = mlp4_reference(x, params)  # f32 reference; kernel uses bf16 MXU operands
    assert out.shape == (B, K)
    # Tolerance loosened for bf16 matmul operands (f32 accumulation keeps error ~1e-3).
    assert jnp.allclose(out, ref, atol=2e-2, rtol=2e-2)

    print("KERNEL_OK")
</pallas_src>

<mosaic_0001>
module attributes {stable_mosaic.version = 11 : i64} {
  func.func @mlp4_kernel(%arg0: i32, %arg1: memref<8x128xbf16, #tpu.memory_space<vmem>>, %arg2: memref<128x128xbf16, #tpu.memory_space<vmem>>, %arg3: memref<1x128xf32, #tpu.memory_space<vmem>>, %arg4: memref<128x128xbf16, #tpu.memory_space<vmem>>, %arg5: memref<1x128xf32, #tpu.memory_space<vmem>>, %arg6: memref<128x128xbf16, #tpu.memory_space<vmem>>, %arg7: memref<1x128xf32, #tpu.memory_space<vmem>>, %arg8: memref<8x128xf32, #tpu.memory_space<vmem>>) attributes {dimension_semantics = [#tpu.dimension_semantics<parallel>], iteration_bounds = array<i64: 1>, scalar_prefetch = 0 : i64, scratch_operands = 0 : i64, tpu.core_type = #tpu.core_type<tc>, window_params = [{transform_indices = @transform_0, window_bounds = array<i64: 8, 128>}, {pipeline_mode = #tpu.pipeline_mode<synchronous>, transform_indices = @transform_1, window_bounds = array<i64: 128, 128>}, {pipeline_mode = #tpu.pipeline_mode<synchronous>, transform_indices = @transform_2, window_bounds = array<i64: 1, 128>}, {pipeline_mode = #tpu.pipeline_mode<synchronous>, transform_indices = @transform_3, window_bounds = array<i64: 128, 128>}, {pipeline_mode = #tpu.pipeline_mode<synchronous>, transform_indices = @transform_4, window_bounds = array<i64: 1, 128>}, {pipeline_mode = #tpu.pipeline_mode<synchronous>, transform_indices = @transform_5, window_bounds = array<i64: 128, 128>}, {pipeline_mode = #tpu.pipeline_mode<synchronous>, transform_indices = @transform_6, window_bounds = array<i64: 1, 128>}, {transform_indices = @transform_7, window_bounds = array<i64: 8, 128>}]} {
    %c0 = arith.constant 0 : index
    %c0_0 = arith.constant 0 : index
    %0 = vector.load %arg1[%c0, %c0_0] : memref<8x128xbf16, #tpu.memory_space<vmem>>, vector<8x128xbf16>
    %c0_1 = arith.constant 0 : index
    %c0_2 = arith.constant 0 : index
    %1 = vector.load %arg2[%c0_1, %c0_2] : memref<128x128xbf16, #tpu.memory_space<vmem>>, vector<128x128xbf16>
    %cst = arith.constant dense<0.000000e+00> : vector<8x128xf32>
    %2 = tpu.matmul %0, %1, %cst {dimension_numbers = #tpu.dot_dimension_numbers<[1], [0], [0], [1], [0, 0, 1, 1], [], []>} : vector<8x128xbf16>, vector<128x128xbf16>, vector<8x128xf32> -> vector<8x128xf32>
    %c0_3 = arith.constant 0 : index
    %c0_4 = arith.constant 0 : index
    %3 = vector.load %arg3[%c0_3, %c0_4] : memref<1x128xf32, #tpu.memory_space<vmem>>, vector<1x128xf32>
    %4 = vector.broadcast %3 : vector<1x128xf32> to vector<8x128xf32>
    %5 = arith.addf %2, %4 : vector<8x128xf32>
    %6 = arith.negf %5 : vector<8x128xf32>
    %7 = math.exp %6 : vector<8x128xf32>
    %cst_5 = arith.constant 1.000000e+00 : f32
    %8 = vector.broadcast %cst_5 : f32 to vector<8x128xf32>
    %9 = arith.addf %8, %7 : vector<8x128xf32>
    %10 = arith.divf %8, %9 : vector<8x128xf32>
    %11 = arith.truncf %10 : vector<8x128xf32> to vector<8x128xbf16>
    %c0_6 = arith.constant 0 : index
    %c0_7 = arith.constant 0 : index
    %12 = vector.load %arg4[%c0_6, %c0_7] : memref<128x128xbf16, #tpu.memory_space<vmem>>, vector<128x128xbf16>
    %cst_8 = arith.constant dense<0.000000e+00> : vector<8x128xf32>
    %13 = tpu.matmul %11, %12, %cst_8 {dimension_numbers = #tpu.dot_dimension_numbers<[1], [0], [0], [1], [0, 0, 1, 1], [], []>} : vector<8x128xbf16>, vector<128x128xbf16>, vector<8x128xf32> -> vector<8x128xf32>
    %c0_9 = arith.constant 0 : index
    %c0_10 = arith.constant 0 : index
    %14 = vector.load %arg5[%c0_9, %c0_10] : memref<1x128xf32, #tpu.memory_space<vmem>>, vector<1x128xf32>
    %15 = vector.broadcast %14 : vector<1x128xf32> to vector<8x128xf32>
    %16 = arith.addf %13, %15 : vector<8x128xf32>
    %17 = arith.negf %16 : vector<8x128xf32>
    %18 = math.exp %17 : vector<8x128xf32>
    %cst_11 = arith.constant 1.000000e+00 : f32
    %19 = vector.broadcast %cst_11 : f32 to vector<8x128xf32>
    %20 = arith.addf %19, %18 : vector<8x128xf32>
    %21 = arith.divf %19, %20 : vector<8x128xf32>
    %22 = arith.truncf %21 : vector<8x128xf32> to vector<8x128xbf16>
    %c0_12 = arith.constant 0 : index
    %c0_13 = arith.constant 0 : index
    %23 = vector.load %arg6[%c0_12, %c0_13] : memref<128x128xbf16, #tpu.memory_space<vmem>>, vector<128x128xbf16>
    %cst_14 = arith.constant dense<0.000000e+00> : vector<8x128xf32>
    %24 = tpu.matmul %22, %23, %cst_14 {dimension_numbers = #tpu.dot_dimension_numbers<[1], [0], [0], [1], [0, 0, 1, 1], [], []>} : vector<8x128xbf16>, vector<128x128xbf16>, vector<8x128xf32> -> vector<8x128xf32>
    %c0_15 = arith.constant 0 : index
    %c0_16 = arith.constant 0 : index
    %25 = vector.load %arg7[%c0_15, %c0_16] : memref<1x128xf32, #tpu.memory_space<vmem>>, vector<1x128xf32>
    %26 = vector.broadcast %25 : vector<1x128xf32> to vector<8x128xf32>
    %27 = arith.addf %24, %26 : vector<8x128xf32>
    %c0_17 = arith.constant 0 : index
    %c0_18 = arith.constant 0 : index
    %28 = vector.load %arg8[%c0_17, %c0_18] : memref<8x128xf32, #tpu.memory_space<vmem>>, vector<8x128xf32>
    tpu.vector_store %arg8[%c0_17, %c0_18], %27 {strides = array<i32>} : memref<8x128xf32, #tpu.memory_space<vmem>>, vector<8x128xf32>,
    return
  }
  func.func @transform_0(%arg0: i32) -> (i32, i32) {
    %c0_i32 = arith.constant 0 : i32
    %c0_i32_0 = arith.constant 0 : i32
    return %arg0, %c0_i32 : i32, i32
  }
  func.func @transform_1(%arg0: i32) -> (i32, i32) {
    %c0_i32 = arith.constant 0 : i32
    %c0_i32_0 = arith.constant 0 : i32
    %c0_i32_1 = arith.constant 0 : i32
    return %c0_i32, %c0_i32_0 : i32, i32
  }
  func.func @transform_2(%arg0: i32) -> (i32, i32) {
    %c0_i32 = arith.constant 0 : i32
    %c0_i32_0 = arith.constant 0 : i32
    %c0_i32_1 = arith.constant 0 : i32
    return %c0_i32, %c0_i32_0 : i32, i32
  }
  func.func @transform_3(%arg0: i32) -> (i32, i32) {
    %c0_i32 = arith.constant 0 : i32
    %c0_i32_0 = arith.constant 0 : i32
    %c0_i32_1 = arith.constant 0 : i32
    return %c0_i32, %c0_i32_0 : i32, i32
  }
  func.func @transform_4(%arg0: i32) -> (i32, i32) {
    %c0_i32 = arith.constant 0 : i32
    %c0_i32_0 = arith.constant 0 : i32
    %c0_i32_1 = arith.constant 0 : i32
    return %c0_i32, %c0_i32_0 : i32, i32
  }
  func.func @transform_5(%arg0: i32) -> (i32, i32) {
    %c0_i32 = arith.constant 0 : i32
    %c0_i32_0 = arith.constant 0 : i32
    %c0_i32_1 = arith.constant 0 : i32
    return %c0_i32, %c0_i32_0 : i32, i32
  }
  func.func @transform_6(%arg0: i32) -> (i32, i32) {
    %c0_i32 = arith.constant 0 : i32
    %c0_i32_0 = arith.constant 0 : i32
    %c0_i32_1 = arith.constant 0 : i32
    return %c0_i32, %c0_i32_0 : i32, i32
  }
  func.func @transform_7(%arg0: i32) -> (i32, i32) {
    %c0_i32 = arith.constant 0 : i32
    %c0_i32_0 = arith.constant 0 : i32
    return %arg0, %c0_i32 : i32, i32
  }
}

</mosaic_0001>

<bundles_post_ra>
// kernel: tpu_custom_call.1
= control target key start
LH: loop header
LB: loop body
LE: loop exit
PB: predicated region body
PF: predicated region fallthrough
CT: control target
= control target key end

     0   :  { %12 = vsyncpa [#allocation3], 0  ;;  %s824_s0 = inlined_call_operand.hbm [shape: bf16[8,128], index: 0, kind: input, shape index: {}]   ;;  %s825_s1 = inlined_call_operand.hbm [shape: bf16[128,128], index: 1, kind: input, shape index: {}]   ;;  %s826_s2 = inlined_call_operand.vmem [shape: f32[1,128], index: 2, kind: input, shape index: {}]   ;;  %s827_s3 = inlined_call_operand.hbm [shape: bf16[128,128], index: 3, kind: input, shape index: {}]   ;;  %s828_s4 = inlined_call_operand.vmem [shape: f32[1,128], index: 4, kind: input, shape index: {}]   ;;  %s829_s5 = inlined_call_operand.hbm [shape: bf16[128,128], index: 5, kind: input, shape index: {}]   ;;  %s830_s6 = inlined_call_operand.vmem [shape: f32[1,128], index: 6, kind: input, shape index: {}]   ;;  %s831_s7 = inlined_call_operand.hbm [shape: f32[8,128], index: 7, kind: output, shape index: {}]  }
   0x1   :  { %13 = vsyncpa [#allocation6], 0 }
   0x2   :  { %14 = vsyncpa [#allocation9], 0 }
   0x3   :  { %15 = vsyncpa [#allocation4], 0  ;;  %s712_s24 = smov [#allocation5]  }
   0x4   :  { %s31_s25 = sshll.u32 %s712_s24, 4  ;;  %s32_s25 = int_to_ptr.vmem [resolvable:$true] %s31_s25 }
   0x5   :  { %s612_s26 = scalar_lea.vmem %s32_s25, 1024  ;;  %p617_p1 = scmp.lt.s32.totalorder %s32_s25, %s32_s25 }
   0x6   :  { %p613_p0 = scmp.ne.s32.totalorder %s32_s25, %s612_s26  ;;  %p618_p2 = scmp.lt.s32.totalorder %s612_s26, %s612_s26 }
   0x8   :  { %p619_p3 = por %p618_p2, %p617_p1 }
   0xa   :  { %p620_p4 = pnand %p619_p3, %p613_p0 }
   0xc   :  { %623 = shalt.err (!%p620_p4)
}
   0xd   :  { %s713_s27 = smov 64   ;;  %s714_s28 = smov 4  }
   0xe   :  { %37 = dma.hbm_to_vmem [thread:$0]  %s825_s1, 1024, %s32_s25, [#allocation6], %s713_s27, %s713_s27, %s714_s28  }
   0xf   :  { %s715_s8 = smov [#allocation2]   ;;  %s716_s10 = smov [#allocation7]  }
  0x10   :  { %s22_s9 = sshll.u32 %s715_s8, 4  ;;  %s45_s11 = sshll.u32 %s716_s10, 4  ;;  %s23_s9 = int_to_ptr.vmem [resolvable:$true] %s22_s9  ;;  %s46_s11 = int_to_ptr.vmem [resolvable:$true] %s45_s11 }
  0x11   :  { %s632_s12 = scalar_lea.vmem %s23_s9, 64  ;;  %p637_p6 = scmp.lt.s32.totalorder %s23_s9, %s23_s9 }
  0x12   :  { %p633_p5 = scmp.ne.s32.totalorder %s23_s9, %s632_s12  ;;  %p638_p7 = scmp.lt.s32.totalorder %s632_s12, %s632_s12 }
  0x14   :  { %p639_p8 = por %p638_p7, %p637_p6 }
  0x16   :  { %p640_p9 = pnand %p639_p8, %p633_p5 }
  0x18   :  { %643 = shalt.err (!%p640_p9)
}
  0x19   :  { %25 = dma.hbm_to_vmem [thread:$0]  %s824_s0, 64, %s23_s9, [#allocation3]  }
  0x1a   :  { %s652_s15 = scalar_lea.vmem %s46_s11, 1024  ;;  %p657_p11 = scmp.lt.s32.totalorder %s46_s11, %s46_s11 }
  0x1b   :  { %p653_p10 = scmp.ne.s32.totalorder %s46_s11, %s652_s15  ;;  %p658_p12 = scmp.lt.s32.totalorder %s652_s15, %s652_s15 }
  0x1d   :  { %p659_p13 = por %p658_p12, %p657_p11 }
  0x1f   :  { %p660_p0 = pnand %p659_p13, %p653_p10 }
  0x21   :  { %663 = shalt.err (!%p660_p0)
}
  0x22   :  { %51 = dma.hbm_to_vmem [thread:$0]  %s827_s3, 1024, %s46_s11, [#allocation6], %s713_s27, %s713_s27, %s714_s28  }
  0x23   :  { %s717_s17 = smov [#allocation8]  }
  0x24   :  { %s59_s18 = sshll.u32 %s717_s17, 4  ;;  %s60_s18 = int_to_ptr.vmem [resolvable:$true] %s59_s18 }
  0x25   :  { %s672_s19 = scalar_lea.vmem %s60_s18, 1024  ;;  %p677_p2 = scmp.lt.s32.totalorder %s60_s18, %s60_s18 }
  0x26   :  { %p673_p1 = scmp.ne.s32.totalorder %s60_s18, %s672_s19  ;;  %p678_p3 = scmp.lt.s32.totalorder %s672_s19, %s672_s19 }
  0x28   :  { %p679_p4 = por %p678_p3, %p677_p2 }
  0x2a   :  { %p680_p5 = pnand %p679_p4, %p673_p1 }
  0x2c   :  { %683 = shalt.err (!%p680_p5)
}
  0x2d   :  { %65 = dma.hbm_to_vmem [thread:$0]  %s829_s5, 1024, %s60_s18, [#allocation9], %s713_s27, %s713_s27, %s714_s28  }
  0x2e   :  { %704 = dma.done.wait [#allocation3], 64  }
  0x2f   :  { %705 = vsyncadd [#allocation3], 4294967232 }
  0x30   :  { %706 = dma.done.wait [#allocation6], 2048  }
  0x31   :  { %707 = vsyncadd [#allocation6], 4294965248 }
  0x32   :  { %708 = dma.done.wait [#allocation9], 1024  }
  0x33   :  { %709 = vsyncadd [#allocation9], 4294966272  ;;  %v718_v0 = vmov 0.0   ;;  %vm719_vm0 = vmmov 0   ;;  %v572_v1 = vld [vmem:[#allocation5 + $0x38] sm:$0xff]   ;;  %v573_v2 = vld [vmem:[#allocation5 + $0x30] sm:$0xff]  }
  0x34   :  { %503 = vmatprep.subr.bf16.mxu0 %v718_v0  ;;  %519 = vmatprep.mubr.msk.bf16.mxu0 %vm719_vm0, %v718_v0  ;;  %v574_v3 = vld [vmem:[#allocation5 + $0x28] sm:$0xff]   ;;  %v575_v4 = vld [vmem:[#allocation5 + $0x20] sm:$0xff]   ;;  %v576_v5 = vld [vmem:[#allocation5 + $0x18] sm:$0xff]   ;;  %s720_s24 = smov [#allocation10]  }
  0x35   :  { %523 = vmatprep.subr.bf16.mxu1 %v718_v0  ;;  %539 = vmatprep.mubr.msk.bf16.mxu1 %vm719_vm0, %v718_v0  ;;  %v577_v6 = vld [vmem:[#allocation5 + $0x10] sm:$0xff]   ;;  %v578_v7 = vld [vmem:[#allocation5 + $0x8] sm:$0xff]   ;;  %v579_v8 = vld [vmem:[#allocation5] sm:$0xff]   ;;  %s436_s25 = sshll.u32 %s720_s24, 4  ;;  %s437_s25 = int_to_ptr.vmem [resolvable:$true] %s436_s25 }
  0x36   :  { %504 = vmatpush3.bf16.msra.mxu0 %v572_v1  ;;  %v81_v9 = vld [vmem:[#allocation2] sm:$0xf]  ;;  %v581_v11 = vld [vmem:[#allocation7 + $0x30] sm:$0xff]   ;;  %v582_v12 = vld [vmem:[#allocation7 + $0x28] sm:$0xff]   ;;  %p689_p7 = scmp.lt.s32.totalorder %s437_s25, %s437_s25 }
  0x37   :  { %505 = vmatprep.subr.bf16.mxu0 %v718_v0  ;;  %v580_v10 = vld [vmem:[#allocation7 + $0x38] sm:$0xff]   ;;  %v583_v13 = vld [vmem:[#allocation7 + $0x20] sm:$0xff]   ;;  %v585_v15 = vld [vmem:[#allocation7 + $0x10] sm:$0xff]  }
  0x38   :  { %524 = vmatpush3.bf16.msra.mxu1 %v580_v10  ;;  %v584_v14 = vld [vmem:[#allocation7 + $0x18] sm:$0xff]   ;;  %v586_v16 = vld [vmem:[#allocation7 + $0x8] sm:$0xff]   ;;  %v587_v17 = vld [vmem:[#allocation7] sm:$0xff]  }
  0x39   :  { %525 = vmatprep.subr.bf16.mxu1 %v718_v0  ;;  %v447_v18 = vld [vmem:[%s826_s2] ss:$0 sm:$0xff]  ;;  %v589_v30 = vld [vmem:[#allocation8 + $0x30] sm:$0xff]   ;;  %v590_v31 = vld [vmem:[#allocation8 + $0x28] sm:$0xff]  }
  0x3a   :  { %506 = vmatpush3.bf16.msra.mxu0 %v573_v2  ;;  %v588_v29 = vld [vmem:[#allocation8 + $0x38] sm:$0xff]   ;;  %v591_v32 = vld [vmem:[#allocation8 + $0x20] sm:$0xff]   ;;  %v593_v34 = vld [vmem:[#allocation8 + $0x10] sm:$0xff]  }
  0x3b   :  { %507 = vmatprep.subr.bf16.mxu0 %v718_v0  ;;  %v592_v33 = vld [vmem:[#allocation8 + $0x18] sm:$0xff]   ;;  %v594_v35 = vld [vmem:[#allocation8 + $0x8] sm:$0xff]   ;;  %v595_v36 = vld [vmem:[#allocation8] sm:$0xff]  }
  0x3c   :  { %526 = vmatpush3.bf16.msra.mxu1 %v581_v11  ;;  %v457_v37 = vld [vmem:[%s828_s4] ss:$0 sm:$0xff]  ;;  %s684_s4 = scalar_lea.vmem %s437_s25, 128 }
  0x3d   :  { %527 = vmatprep.subr.bf16.mxu1 %v718_v0  ;;  %v467_v48 = vld [vmem:[%s830_s6] ss:$0 sm:$0xff]  ;;  %p685_p6 = scmp.ne.s32.totalorder %s437_s25, %s684_s4  ;;  %p690_p8 = scmp.lt.s32.totalorder %s684_s4, %s684_s4 }
  0x3e   :  { %508 = vmatpush3.bf16.msra.mxu0 %v574_v3 }
  0x3f   :  { %509 = vmatprep.subr.bf16.mxu0 %v718_v0  ;;  %p691_p9 = por %p690_p8, %p689_p7 }
  0x40   :  { %528 = vmatpush3.bf16.msra.mxu1 %v582_v12 }
  0x41   :  { %529 = vmatprep.subr.bf16.mxu1 %v718_v0  ;;  %p692_p10 = pnand %p691_p9, %p685_p6 }
  0x42   :  { %510 = vmatpush3.bf16.msra.mxu0 %v575_v4 }
  0x43   :  { %511 = vmatprep.subr.bf16.mxu0 %v718_v0 }
  0x44   :  { %530 = vmatpush3.bf16.msra.mxu1 %v583_v13 }
  0x45   :  { %531 = vmatprep.subr.bf16.mxu1 %v718_v0 }
  0x46   :  { %512 = vmatpush3.bf16.msra.mxu0 %v576_v5 }
  0x47   :  { %513 = vmatprep.subr.bf16.mxu0 %v718_v0 }
  0x48   :  { %532 = vmatpush3.bf16.msra.mxu1 %v584_v14 }
  0x49   :  { %533 = vmatprep.subr.bf16.mxu1 %v718_v0 }
  0x4a   :  { %514 = vmatpush3.bf16.msra.mxu0 %v577_v6 }
  0x4b   :  { %515 = vmatprep.subr.bf16.mxu0 %v718_v0 }
  0x4c   :  { %534 = vmatpush3.bf16.msra.mxu1 %v585_v15 }
  0x4d   :  { %535 = vmatprep.subr.bf16.mxu1 %v718_v0 }
  0x4e   :  { %516 = vmatpush3.bf16.msra.mxu0 %v578_v7 }
  0x4f   :  { %517 = vmatprep.subr.bf16.mxu0 %v718_v0 }
  0x50   :  { %536 = vmatpush3.bf16.msra.mxu1 %v586_v16 }
  0x51   :  { %537 = vmatprep.subr.bf16.mxu1 %v718_v0 }
  0x52   :  { %518 = vmatpush3.bf16.msra.mxu0 %v579_v8 }
  0x53   :  { %543 = vmatprep.subr.bf16.mxu0 %v718_v0 }
  0x54   :  { %538 = vmatpush3.bf16.msra.mxu1 %v587_v17 }
  0x55   :  { %520 = vmatmul.mubr.bf16.vlgmr.msra.gmra.mxu0 %v81_v9 }
  0x56   :  { %559 = vmatprep.mubr.msk.bf16.mxu0 %vm719_vm0, %v718_v0  ;;  %544 = vmatpush3.bf16.msra.mxu0 %v588_v29 }
  0x57   :  { %545 = vmatprep.subr.bf16.mxu0 %v718_v0 }
  0x5a   :  { %546 = vmatpush3.bf16.msra.mxu0 %v589_v30 }
  0x5b   :  { %547 = vmatprep.subr.bf16.mxu0 %v718_v0 }
  0x5e   :  { %548 = vmatpush3.bf16.msra.mxu0 %v590_v31 }
  0x5f   :  { %549 = vmatprep.subr.bf16.mxu0 %v718_v0 }
  0x62   :  { %550 = vmatpush3.bf16.msra.mxu0 %v591_v32 }
  0x63   :  { %551 = vmatprep.subr.bf16.mxu0 %v718_v0 }
  0x66   :  { %552 = vmatpush3.bf16.msra.mxu0 %v592_v33 }
  0x67   :  { %553 = vmatprep.subr.bf16.mxu0 %v718_v0 }
  0x6a   :  { %554 = vmatpush3.bf16.msra.mxu0 %v593_v34 }
  0x6b   :  { %555 = vmatprep.subr.bf16.mxu0 %v718_v0 }
  0x6e   :  { %556 = vmatpush3.bf16.msra.mxu0 %v594_v35 }
  0x6f   :  { %557 = vmatprep.subr.bf16.mxu0 %v718_v0 }
  0x72   :  { %558 = vmatpush3.bf16.msra.mxu0 %v595_v36 }
 0x115   :  { %v187_v19 = vpop.f32.mrf.mxu0 }
 0x116   :  { %v188_v20 = vadd.f32 %v447_v18, %v187_v19 }
 0x117   :  { %v521_v21 = vpop.f32.mrf.mxu0 }
 0x118   :  { %v456_v22 = vmul.f32 -1.442695, %v188_v20 }
 0x119   :  { %v190_v23 = vpop.f32.mrf.mxu0 }
 0x11a   :  { %596 = vpow2.f32 %v456_v22 }
 0x11b   :  { %v522_v24 = vpop.f32.mrf.mxu0 }
 0x127   :  { %v597_v25 = vpop.eup %596 }
 0x128   :  { %v196_v26 = vadd.f32 1.0, %v597_v25 }
 0x12a   :  { %598 = vrcp.f32 %v196_v26 }
 0x137   :  { %v599_v27 = vpop.eup %598 }
 0x138   :  { %v199_v28 = vpack.c.bf16 %v599_v27, %v599_v27 }
 0x13a   :  { %540 = vmatmul.mubr.bf16.vlgmr.msra.gmra.mxu1 %v199_v28 }
 0x1fa   :  { %v305_v38 = vpop.f32.mrf.mxu1 }
 0x1fb   :  { %v306_v39 = vadd.f32 %v457_v37, %v305_v38 }
 0x1fc   :  { %v541_v40 = vpop.f32.mrf.mxu1 }
 0x1fd   :  { %v466_v41 = vmul.f32 -1.442695, %v306_v39 }
 0x1fe   :  { %v308_v42 = vpop.f32.mrf.mxu1 }
 0x1ff   :  { %600 = vpow2.f32 %v466_v41 }
 0x200   :  { %v542_v43 = vpop.f32.mrf.mxu1 }
 0x20c   :  { %v601_v44 = vpop.eup %600 }
 0x20d   :  { %v314_v45 = vadd.f32 1.0, %v601_v44 }
 0x20f   :  { %602 = vrcp.f32 %v314_v45 }
 0x21c   :  { %v603_v46 = vpop.eup %602 }
 0x21d   :  { %v317_v47 = vpack.c.bf16 %v603_v46, %v603_v46 }
 0x21f   :  { %560 = vmatmul.mubr.bf16.vlgmr.msra.gmra.mxu0 %v317_v47 }
 0x2df   :  { %v423_v49 = vpop.f32.mrf.mxu0 }
 0x2e0   :  { %v424_v50 = vadd.f32 %v467_v48, %v423_v49 }
 0x2e1   :  { %v561_v51 = vpop.f32.mrf.mxu0 }
 0x2e2   :  { %429 = vst [vmem:[#allocation10] sm:$0xff] %v424_v50 }
 0x2e3   :  { %v426_v52 = vpop.f32.mrf.mxu0 }
 0x2e4   :  { %695 = shalt.err (!%p692_p10)
}
 0x2e5   :  { %439 = dma.vmem_to_hbm [thread:$0]  %s437_s25, 128, %s831_s7, [#allocation4]   ;;  %v562_v53 = vpop.f32.mrf.mxu0 }
 0x2e6   :  { %710 = dma.done.wait [#allocation4], 128  }
 0x2e7   :  { %711 = vsyncadd [#allocation4], 4294967168 }
 0x2e8   :  { %443 = vsyncpa [#allocation3], 1 }
 0x2e9   :  { %444 = vsyncpa [#allocation6], 1 }
 0x2ea   :  { %445 = vsyncpa [#allocation9], 1 }
 0x2eb   :  { %446 = vsyncpa [#allocation4], 1 }

</bundles_post_ra>
